<compile_context>
chip_gen: v6e
topology: v6e:2x2x1
jax: 0.10.0
libtpu: 0.0.40
codegen_flags: <defaults>
</compile_context>

<pallas_src>
import functools

import jax
import jax.numpy as jnp
from jax.experimental import pallas as pl
from jax.experimental.pallas import tpu as pltpu


LANE = 128
SUBLANE_BF16 = 16          # bf16 packs 16 rows per vreg


def _round_up(a, b):
    return (a + b - 1) // b * b


def _pick_feature_tile(D, max_tile=512):
    """Largest multiple of 128 that divides D (<= max_tile); full D otherwise."""
    if D % LANE != 0:
        return D           # TODO(synk): zero-pad D for feature dims not 128-aligned
    t = min(D, max_tile)
    t -= t % LANE
    while D % t != 0:
        t -= LANE
    return t


# ------------------------------ fused kernel ------------------------------- #

def _vae_kernel(x_ref, w1_ref, b1_ref, wh_ref, bh_ref, w2_ref, b2_ref,
                w3_ref, b3_ref, eps_ref,
                recon_ref, zmean_ref, zlogvar_ref, z_ref,
                h1_acc, h2_buf):
    # grid = (batch_tile, phase, d_tile); phase 0 = encoder K-reduction over D,
    # phase 1 = decoder N-tiles over D.
    p = pl.program_id(1)
    d = pl.program_id(2)
    nd = pl.num_programs(2)

    @pl.when(p == 0)
    def _encoder():
        @pl.when(d == 0)
        def _():
            h1_acc[...] = jnp.zeros_like(h1_acc)

        # x arrives f32; cast to bf16 right before the MXU (hidden under matmul).
        h1_acc[...] += jnp.dot(x_ref[...].astype(jnp.bfloat16), w1_ref[...],
                               preferred_element_type=jnp.float32)

        @pl.when(d == nd - 1)
        def _finish_encoder():
            h1 = jnp.maximum(h1_acc[...] + b1_ref[...], 0.0)
            # fused latent heads: one matmul -> [z_mean | z_log_var]
            heads = jnp.dot(h1.astype(jnp.bfloat16), wh_ref[...],
                            preferred_element_type=jnp.float32) + bh_ref[...]
            lp = zmean_ref.shape[-1]
            z_mean = heads[:, :lp]
            z_log_var = heads[:, lp:]
            # reparameterization (f32; exp runs on the EUP slot)
            z = z_mean + jnp.exp(0.5 * z_log_var) * eps_ref[...]
            zmean_ref[...] = z_mean
            zlogvar_ref[...] = z_log_var
            z_ref[...] = z
            # decoder hidden layer; kept in VMEM for phase 1
            h2 = jnp.dot(z.astype(jnp.bfloat16), w2_ref[...],
                         preferred_element_type=jnp.float32) + b2_ref[...]
            h2_buf[...] = jnp.maximum(h2, 0.0).astype(jnp.bfloat16)

    @pl.when(p == 1)
    def _decoder():
        recon_ref[...] = (
            jnp.dot(h2_buf[...], w3_ref[...], preferred_element_type=jnp.float32)
            + b3_ref[...]
        ).astype(recon_ref.dtype)


# ------------------------------- wrapper ----------------------------------- #

def _vae_forward_flat(x_flat, eps, fp, latent_dim):
    """x_flat: (B, D) f32, eps: (B, latent_dim) f32."""
    B, D = x_flat.shape
    HP = fp["w1"].shape[1]
    LP = fp["wh"].shape[1] // 2

    # Batch tile: multiple of 16 (bf16 sublane pack), >=2 grid steps when B
    # permits (v7x has 2 TensorCores).  For tiny B use block == full batch
    # (no padding, no partial batch block).
    if B <= SUBLANE_BF16:
        TM = B
    else:
        TM = min(256, _round_up((B + 1) // 2, SUBLANE_BF16))
    nb = (B + TM - 1) // TM

    TD = _pick_feature_tile(D)
    nd = D // TD

    # eps latent padding is tiny (B x 128 f32); zeros keep padded latent
    # columns exactly 0 through the decoder (matches zero-padded wh/bh/w2).
    eps_p = jnp.pad(eps, ((0, 0), (0, LP - eps.shape[1])))

    # Encoder-phase tiles follow d and park at the last tile during phase 1
    # (no refetch); decoder-phase tiles park at 0 during phase 0.
    enc_idx = lambda d_, p_: d_ * (1 - p_) + (nd - 1) * p_
    dec_idx = lambda d_, p_: d_ * p_

    in_specs = [
        pl.BlockSpec((TM, TD), lambda b, p_, d_: (b, enc_idx(d_, p_))),       # x (f32)
        pl.BlockSpec((TD, HP), lambda b, p_, d_: (enc_idx(d_, p_), 0)),       # w1
        pl.BlockSpec((1, HP), lambda b, p_, d_: (0, 0)),                      # b1
        pl.BlockSpec((HP, 2 * LP), lambda b, p_, d_: (0, 0)),                 # wh
        pl.BlockSpec((1, 2 * LP), lambda b, p_, d_: (0, 0)),                  # bh
        pl.BlockSpec((LP, HP), lambda b, p_, d_: (0, 0)),                     # w2
        pl.BlockSpec((1, HP), lambda b, p_, d_: (0, 0)),                      # b2
        pl.BlockSpec((HP, TD), lambda b, p_, d_: (0, dec_idx(d_, p_))),       # w3
        pl.BlockSpec((1, TD), lambda b, p_, d_: (0, dec_idx(d_, p_))),        # b3
        pl.BlockSpec((TM, LP), lambda b, p_, d_: (b, 0)),                     # eps
    ]
    out_shapes = (
        jax.ShapeDtypeStruct((B, D), jnp.bfloat16),     # reconstruction (bf16 writeback)
        jax.ShapeDtypeStruct((B, LP), jnp.float32),     # z_mean
        jax.ShapeDtypeStruct((B, LP), jnp.float32),     # z_log_var
        jax.ShapeDtypeStruct((B, LP), jnp.float32),     # z
    )
    out_specs = (
        pl.BlockSpec((TM, TD), lambda b, p_, d_: (b, dec_idx(d_, p_))),
        pl.BlockSpec((TM, LP), lambda b, p_, d_: (b, 0)),
        pl.BlockSpec((TM, LP), lambda b, p_, d_: (b, 0)),
        pl.BlockSpec((TM, LP), lambda b, p_, d_: (b, 0)),
    )

    # VMEM budget: 2x (default double-buffering) per pipelined block + scratch,
    # with generous headroom; kept below v7x's 64 MiB physical VMEM.
    block_bytes = (TM * TD * 4 + TD * HP * 2 + HP * 4 + HP * 2 * LP * 2
                   + 2 * LP * 4 + LP * HP * 2 + HP * 4 + HP * TD * 2 + TD * 4
                   + TM * LP * 4 + TM * TD * 2 + 3 * TM * LP * 4)
    scratch_bytes = TM * HP * 4 + TM * HP * 2
    vmem_limit = int(min(56 << 20, max(32 << 20, 3 * (2 * block_bytes + scratch_bytes))))

    flops = 2 * B * (D * HP + HP * 2 * LP + LP * HP + HP * D)
    bytes_accessed = (B * D * 4 + B * D * 2               # x read (f32) + recon write (bf16)
                      + nb * 2 * (D * HP * 2)             # w1 + w3 streamed per batch block
                      + (HP * 2 * LP + LP * HP) * 2       # resident weights
                      + 4 * B * LP * 4)                   # eps + latent outputs
    cost = pl.CostEstimate(flops=int(flops), transcendentals=int(B * LP),
                           bytes_accessed=int(bytes_accessed))

    recon, z_mean, z_log_var, z = pl.pallas_call(
        _vae_kernel,
        out_shape=out_shapes,
        grid=(nb, 2, nd),
        in_specs=in_specs,
        out_specs=out_specs,
        scratch_shapes=[pltpu.VMEM((TM, HP), jnp.float32),     # h1 accumulator
                        pltpu.VMEM((TM, HP), jnp.bfloat16)],   # h2 (decoder hidden)
        compiler_params=pltpu.CompilerParams(
            dimension_semantics=("parallel", "arbitrary", "arbitrary"),
            vmem_limit_bytes=vmem_limit),
        cost_estimate=cost,
    )(x_flat, fp["w1"], fp["b1"], fp["wh"], fp["bh"],
      fp["w2"], fp["b2"], fp["w3"], fp["b3"], eps_p)

    return (recon, z_mean[:, :latent_dim], z_log_var[:, :latent_dim],
            z[:, :latent_dim])


def base_vae_forward(x, fused_params, eps, latent_dim):
    """x: (B, T, H, W) -> (reconstruction, z_mean, z_log_var, z)."""
    B, T, Hs, Ws = x.shape
    x_flat = x.reshape(B, T * Hs * Ws)
    recon_flat, z_mean, z_log_var, z = _vae_forward_flat(
        x_flat, eps, fused_params, latent_dim)
    return recon_flat.reshape(B, T, Hs, Ws), z_mean, z_log_var, z


# ----------------------------- parameters ---------------------------------- #

def init_params(key, D, H, L):
    """Raw (unpadded) parameters. Weights bf16 (MXU operands), biases f32."""
    ks = jax.random.split(key, 5)
    scale = lambda fan_in: 1.0 / jnp.sqrt(fan_in)
    wt = lambda k, s, f: (jax.random.normal(k, s, jnp.float32) * scale(f)).astype(jnp.bfloat16)
    return {
        # encoder
        "w1": wt(ks[0], (D, H), D), "b1": jnp.zeros((1, H), jnp.float32),
        "wm": wt(ks[1], (H, L), H), "bm": jnp.zeros((1, L), jnp.float32),
        "wv": wt(ks[2], (H, L), H), "bv": jnp.zeros((1, L), jnp.float32),
        # decoder
        "w2": wt(ks[3], (L, H), L), "b2": jnp.zeros((1, H), jnp.float32),
        "w3": wt(ks[4], (H, D), H), "b3": jnp.zeros((1, D), jnp.float32),
    }


def prepare_fused_params(params, latent_dim, hidden_multiple=LANE):
    """Pad latent (and optionally hidden) dims to lane multiples, fuse heads.

    Pass hidden_multiple=256 on v6e/v7x when the hidden size is not already
    MXU-friendly; zero padding keeps results identical.
    """
    D, H = params["w1"].shape
    LP = _round_up(latent_dim, LANE)
    HP = _round_up(H, hidden_multiple)

    def pad2(a, rows, cols):
        return jnp.pad(a, ((0, rows - a.shape[0]), (0, cols - a.shape[1])))

    wh = jnp.concatenate(
        [pad2(params["wm"], HP, LP), pad2(params["wv"], HP, LP)], axis=1)
    bh = jnp.concatenate(
        [pad2(params["bm"], 1, LP), pad2(params["bv"], 1, LP)], axis=1)
    return {
        "w1": pad2(params["w1"], D, HP).astype(jnp.bfloat16),
        "b1": pad2(params["b1"], 1, HP).astype(jnp.float32),
        "wh": wh.astype(jnp.bfloat16),
        "bh": bh.astype(jnp.float32),
        "w2": pad2(params["w2"], LP, HP).astype(jnp.bfloat16),
        "b2": pad2(params["b2"], 1, HP).astype(jnp.float32),
        "w3": pad2(params["w3"], HP, D).astype(jnp.bfloat16),
        "b3": params["b3"].astype(jnp.float32),
    }


# ------------------------------ reference ---------------------------------- #

def _reference(x, params, eps):
    B = x.shape[0]
    x_flat = x.reshape(B, -1).astype(jnp.bfloat16)
    f32 = jnp.float32
    h1 = jnp.maximum(
        jnp.dot(x_flat, params["w1"], preferred_element_type=f32) + params["b1"], 0.0)
    zm = jnp.dot(h1.astype(jnp.bfloat16), params["wm"], preferred_element_type=f32) + params["bm"]
    zlv = jnp.dot(h1.astype(jnp.bfloat16), params["wv"], preferred_element_type=f32) + params["bv"]
    z = zm + jnp.exp(0.5 * zlv) * eps
    h2 = jnp.maximum(
        jnp.dot(z.astype(jnp.bfloat16), params["w2"], preferred_element_type=f32) + params["b2"], 0.0)
    recon = jnp.dot(h2.astype(jnp.bfloat16), params["w3"], preferred_element_type=f32) + params["b3"]
    return recon.reshape(x.shape), zm, zlv, z


# --------------------------------- main ------------------------------------ #

if __name__ == "__main__":
    B, T, Hs, Ws = 2, 8, 16, 16          # seq_len=8, feat_dim=(16,16)
    LATENT, HIDDEN = 32, 128
    D = T * Hs * Ws

    key = jax.random.PRNGKey(0)
    k_x, k_eps, k_p = jax.random.split(key, 3)
    x = jax.random.normal(k_x, (B, T, Hs, Ws), jnp.float32)
    eps = jax.random.normal(k_eps, (B, LATENT), jnp.float32)

    params = init_params(k_p, D, HIDDEN, LATENT)
    fused = prepare_fused_params(params, LATENT)

    fwd = jax.jit(functools.partial(base_vae_forward, latent_dim=LATENT))
    recon, z_mean, z_log_var, z = fwd(x, fused, eps)
    jax.block_until_ready((recon, z_mean, z_log_var, z))

    assert recon.shape == x.shape
    assert z_mean.shape == (B, LATENT)
    assert z_log_var.shape == (B, LATENT)
    assert z.shape == (B, LATENT)

    r_recon, r_zm, r_zlv, r_z = _reference(x, params, eps)
    assert jnp.allclose(recon.astype(jnp.float32), r_recon, rtol=5e-2, atol=5e-2)
    assert jnp.allclose(z_mean, r_zm, rtol=5e-2, atol=5e-2)
    assert jnp.allclose(z_log_var, r_zlv, rtol=5e-2, atol=5e-2)
    assert jnp.allclose(z, r_z, rtol=5e-2, atol=5e-2)

    print("KERNEL_OK")
</pallas_src>

<mosaic_0001>
module attributes {stable_mosaic.version = 11 : i64} {
  func.func @_vae_kernel(%arg0: i32, %arg1: i32, %arg2: i32, %arg3: memref<2x512xf32, #tpu.memory_space<vmem>>, %arg4: memref<512x128xbf16, #tpu.memory_space<vmem>>, %arg5: memref<1x128xf32, #tpu.memory_space<vmem>>, %arg6: memref<128x256xbf16, #tpu.memory_space<vmem>>, %arg7: memref<1x256xf32, #tpu.memory_space<vmem>>, %arg8: memref<128x128xbf16, #tpu.memory_space<vmem>>, %arg9: memref<1x128xf32, #tpu.memory_space<vmem>>, %arg10: memref<128x512xbf16, #tpu.memory_space<vmem>>, %arg11: memref<1x512xf32, #tpu.memory_space<vmem>>, %arg12: memref<2x128xf32, #tpu.memory_space<vmem>>, %arg13: memref<2x512xbf16, #tpu.memory_space<vmem>>, %arg14: memref<2x128xf32, #tpu.memory_space<vmem>>, %arg15: memref<2x128xf32, #tpu.memory_space<vmem>>, %arg16: memref<2x128xf32, #tpu.memory_space<vmem>>, %arg17: memref<2x128xf32, #tpu.memory_space<vmem>>, %arg18: memref<2x128xbf16, #tpu.memory_space<vmem>>) attributes {dimension_semantics = [#tpu.dimension_semantics<parallel>, #tpu.dimension_semantics<arbitrary>, #tpu.dimension_semantics<arbitrary>], iteration_bounds = array<i64: 1, 2, 4>, scalar_prefetch = 0 : i64, scratch_operands = 2 : i64, tpu.core_type = #tpu.core_type<tc>, window_params = [{transform_indices = @transform_0, window_bounds = array<i64: 2, 512>}, {transform_indices = @transform_1, window_bounds = array<i64: 512, 128>}, {pipeline_mode = #tpu.pipeline_mode<synchronous>, transform_indices = @transform_2, window_bounds = array<i64: 1, 128>}, {pipeline_mode = #tpu.pipeline_mode<synchronous>, transform_indices = @transform_3, window_bounds = array<i64: 128, 256>}, {pipeline_mode = #tpu.pipeline_mode<synchronous>, transform_indices = @transform_4, window_bounds = array<i64: 1, 256>}, {pipeline_mode = #tpu.pipeline_mode<synchronous>, transform_indices = @transform_5, window_bounds = array<i64: 128, 128>}, {pipeline_mode = #tpu.pipeline_mode<synchronous>, transform_indices = @transform_6, window_bounds = array<i64: 1, 128>}, {transform_indices = @transform_7, window_bounds = array<i64: 128, 512>}, {transform_indices = @transform_8, window_bounds = array<i64: 1, 512>}, {transform_indices = @transform_9, window_bounds = array<i64: 2, 128>}, {transform_indices = @transform_10, window_bounds = array<i64: 2, 512>}, {transform_indices = @transform_11, window_bounds = array<i64: 2, 128>}, {transform_indices = @transform_12, window_bounds = array<i64: 2, 128>}, {transform_indices = @transform_13, window_bounds = array<i64: 2, 128>}]} {
    %c0_i32 = arith.constant 0 : i32
    %0 = arith.cmpi eq, %arg1, %c0_i32 : i32
    %1 = arith.extui %0 : i1 to i32
    %c0_i32_0 = arith.constant 0 : i32
    %2 = arith.cmpi ne, %1, %c0_i32_0 : i32
    scf.if %2 {
      %c0_i32_2 = arith.constant 0 : i32
      %6 = arith.cmpi eq, %arg2, %c0_i32_2 : i32
      %7 = arith.extui %6 : i1 to i32
      %c0_i32_3 = arith.constant 0 : i32
      %8 = arith.cmpi ne, %7, %c0_i32_3 : i32
      scf.if %8 {
        %cst_12 = arith.constant 0.000000e+00 : f32
        %19 = vector.broadcast %cst_12 : f32 to vector<2x128xf32>
        %c0_13 = arith.constant 0 : index
        %c0_14 = arith.constant 0 : index
        %20 = vector.load %arg17[%c0_13, %c0_14] : memref<2x128xf32, #tpu.memory_space<vmem>>, vector<2x128xf32>
        tpu.vector_store %arg17[%c0_13, %c0_14], %19 {strides = array<i32>} : memref<2x128xf32, #tpu.memory_space<vmem>>, vector<2x128xf32>,
      } else {
      }
      %c0 = arith.constant 0 : index
      %c0_4 = arith.constant 0 : index
      %9 = vector.load %arg17[%c0, %c0_4] : memref<2x128xf32, #tpu.memory_space<vmem>>, vector<2x128xf32>
      %c0_5 = arith.constant 0 : index
      %c0_6 = arith.constant 0 : index
      %10 = vector.load %arg3[%c0_5, %c0_6] : memref<2x512xf32, #tpu.memory_space<vmem>>, vector<2x512xf32>
      %11 = arith.truncf %10 : vector<2x512xf32> to vector<2x512xbf16>
      %c0_7 = arith.constant 0 : index
      %c0_8 = arith.constant 0 : index
      %12 = vector.load %arg4[%c0_7, %c0_8] : memref<512x128xbf16, #tpu.memory_space<vmem>>, vector<512x128xbf16>
      %cst = arith.constant dense<0.000000e+00> : vector<2x128xf32>
      %13 = tpu.matmul %11, %12, %cst {dimension_numbers = #tpu.dot_dimension_numbers<[1], [0], [0], [1], [0, 0, 1, 1], [], []>} : vector<2x512xbf16>, vector<512x128xbf16>, vector<2x128xf32> -> vector<2x128xf32>
      %14 = arith.addf %9, %13 : vector<2x128xf32>
      %c0_9 = arith.constant 0 : index
      %c0_10 = arith.constant 0 : index
      %15 = vector.load %arg17[%c0_9, %c0_10] : memref<2x128xf32, #tpu.memory_space<vmem>>, vector<2x128xf32>
      tpu.vector_store %arg17[%c0_9, %c0_10], %14 {strides = array<i32>} : memref<2x128xf32, #tpu.memory_space<vmem>>, vector<2x128xf32>,
      %c3_i32 = arith.constant 3 : i32
      %16 = arith.cmpi eq, %arg2, %c3_i32 : i32
      %17 = arith.extui %16 : i1 to i32
      %c0_i32_11 = arith.constant 0 : i32
      %18 = arith.cmpi ne, %17, %c0_i32_11 : i32
      scf.if %18 {
        %c0_12 = arith.constant 0 : index
        %c0_13 = arith.constant 0 : index
        %19 = vector.load %arg17[%c0_12, %c0_13] : memref<2x128xf32, #tpu.memory_space<vmem>>, vector<2x128xf32>
        %c0_14 = arith.constant 0 : index
        %c0_15 = arith.constant 0 : index
        %20 = vector.load %arg5[%c0_14, %c0_15] : memref<1x128xf32, #tpu.memory_space<vmem>>, vector<1x128xf32>
        %21 = vector.broadcast %20 : vector<1x128xf32> to vector<2x128xf32>
        %22 = arith.addf %19, %21 : vector<2x128xf32>
        %cst_16 = arith.constant 0.000000e+00 : f32
        %23 = vector.broadcast %cst_16 : f32 to vector<2x128xf32>
        %24 = arith.maximumf %22, %23 : vector<2x128xf32>
        %25 = arith.truncf %24 : vector<2x128xf32> to vector<2x128xbf16>
        %c0_17 = arith.constant 0 : index
        %c0_18 = arith.constant 0 : index
        %26 = vector.load %arg6[%c0_17, %c0_18] : memref<128x256xbf16, #tpu.memory_space<vmem>>, vector<128x256xbf16>
        %cst_19 = arith.constant dense<0.000000e+00> : vector<2x256xf32>
        %27 = tpu.matmul %25, %26, %cst_19 {dimension_numbers = #tpu.dot_dimension_numbers<[1], [0], [0], [1], [0, 0, 1, 1], [], []>} : vector<2x128xbf16>, vector<128x256xbf16>, vector<2x256xf32> -> vector<2x256xf32>
        %c0_20 = arith.constant 0 : index
        %c0_21 = arith.constant 0 : index
        %28 = vector.load %arg7[%c0_20, %c0_21] : memref<1x256xf32, #tpu.memory_space<vmem>>, vector<1x256xf32>
        %29 = vector.broadcast %28 : vector<1x256xf32> to vector<2x256xf32>
        %30 = arith.addf %27, %29 : vector<2x256xf32>
        %31 = vector.extract_strided_slice %30 {offsets = [0, 0], sizes = [2, 128], strides = [1, 1]} : vector<2x256xf32> to vector<2x128xf32>
        %32 = vector.extract_strided_slice %30 {offsets = [0, 128], sizes = [2, 128], strides = [1, 1]} : vector<2x256xf32> to vector<2x128xf32>
        %cst_22 = arith.constant 5.000000e-01 : f32
        %33 = vector.broadcast %cst_22 : f32 to vector<2x128xf32>
        %34 = arith.mulf %33, %32 : vector<2x128xf32>
        %35 = math.exp %34 : vector<2x128xf32>
        %c0_23 = arith.constant 0 : index
        %c0_24 = arith.constant 0 : index
        %36 = vector.load %arg12[%c0_23, %c0_24] : memref<2x128xf32, #tpu.memory_space<vmem>>, vector<2x128xf32>
        %37 = arith.mulf %35, %36 : vector<2x128xf32>
        %38 = arith.addf %31, %37 : vector<2x128xf32>
        %c0_25 = arith.constant 0 : index
        %c0_26 = arith.constant 0 : index
        %39 = vector.load %arg14[%c0_25, %c0_26] : memref<2x128xf32, #tpu.memory_space<vmem>>, vector<2x128xf32>
        tpu.vector_store %arg14[%c0_25, %c0_26], %31 {strides = array<i32>} : memref<2x128xf32, #tpu.memory_space<vmem>>, vector<2x128xf32>,
        %c0_27 = arith.constant 0 : index
        %c0_28 = arith.constant 0 : index
        %40 = vector.load %arg15[%c0_27, %c0_28] : memref<2x128xf32, #tpu.memory_space<vmem>>, vector<2x128xf32>
        tpu.vector_store %arg15[%c0_27, %c0_28], %32 {strides = array<i32>} : memref<2x128xf32, #tpu.memory_space<vmem>>, vector<2x128xf32>,
        %c0_29 = arith.constant 0 : index
        %c0_30 = arith.constant 0 : index
        %41 = vector.load %arg16[%c0_29, %c0_30] : memref<2x128xf32, #tpu.memory_space<vmem>>, vector<2x128xf32>
        tpu.vector_store %arg16[%c0_29, %c0_30], %38 {strides = array<i32>} : memref<2x128xf32, #tpu.memory_space<vmem>>, vector<2x128xf32>,
        %42 = arith.truncf %38 : vector<2x128xf32> to vector<2x128xbf16>
        %c0_31 = arith.constant 0 : index
        %c0_32 = arith.constant 0 : index
        %43 = vector.load %arg8[%c0_31, %c0_32] : memref<128x128xbf16, #tpu.memory_space<vmem>>, vector<128x128xbf16>
        %cst_33 = arith.constant dense<0.000000e+00> : vector<2x128xf32>
        %44 = tpu.matmul %42, %43, %cst_33 {dimension_numbers = #tpu.dot_dimension_numbers<[1], [0], [0], [1], [0, 0, 1, 1], [], []>} : vector<2x128xbf16>, vector<128x128xbf16>, vector<2x128xf32> -> vector<2x128xf32>
        %c0_34 = arith.constant 0 : index
        %c0_35 = arith.constant 0 : index
        %45 = vector.load %arg9[%c0_34, %c0_35] : memref<1x128xf32, #tpu.memory_space<vmem>>, vector<1x128xf32>
        %46 = vector.broadcast %45 : vector<1x128xf32> to vector<2x128xf32>
        %47 = arith.addf %44, %46 : vector<2x128xf32>
        %cst_36 = arith.constant 0.000000e+00 : f32
        %48 = vector.broadcast %cst_36 : f32 to vector<2x128xf32>
        %49 = arith.maximumf %47, %48 : vector<2x128xf32>
        %50 = arith.truncf %49 : vector<2x128xf32> to vector<2x128xbf16>
        %c0_37 = arith.constant 0 : index
        %c0_38 = arith.constant 0 : index
        %51 = vector.load %arg18[%c0_37, %c0_38] : memref<2x128xbf16, #tpu.memory_space<vmem>>, vector<2x128xbf16>
        tpu.vector_store %arg18[%c0_37, %c0_38], %50 {strides = array<i32>} : memref<2x128xbf16, #tpu.memory_space<vmem>>, vector<2x128xbf16>,
      } else {
      }
    } else {
    }
    %c1_i32 = arith.constant 1 : i32
    %3 = arith.cmpi eq, %arg1, %c1_i32 : i32
    %4 = arith.extui %3 : i1 to i32
    %c0_i32_1 = arith.constant 0 : i32
    %5 = arith.cmpi ne, %4, %c0_i32_1 : i32
    scf.if %5 {
      %c0 = arith.constant 0 : index
      %c0_2 = arith.constant 0 : index
      %6 = vector.load %arg18[%c0, %c0_2] : memref<2x128xbf16, #tpu.memory_space<vmem>>, vector<2x128xbf16>
      %c0_3 = arith.constant 0 : index
      %c0_4 = arith.constant 0 : index
      %7 = vector.load %arg10[%c0_3, %c0_4] : memref<128x512xbf16, #tpu.memory_space<vmem>>, vector<128x512xbf16>
      %cst = arith.constant dense<0.000000e+00> : vector<2x512xf32>
      %8 = tpu.matmul %6, %7, %cst {dimension_numbers = #tpu.dot_dimension_numbers<[1], [0], [0], [1], [0, 0, 1, 1], [], []>} : vector<2x128xbf16>, vector<128x512xbf16>, vector<2x512xf32> -> vector<2x512xf32>
      %c0_5 = arith.constant 0 : index
      %c0_6 = arith.constant 0 : index
      %9 = vector.load %arg11[%c0_5, %c0_6] : memref<1x512xf32, #tpu.memory_space<vmem>>, vector<1x512xf32>
      %10 = vector.broadcast %9 : vector<1x512xf32> to vector<2x512xf32>
      %11 = arith.addf %8, %10 : vector<2x512xf32>
      %12 = arith.truncf %11 : vector<2x512xf32> to vector<2x512xbf16>
      %c0_7 = arith.constant 0 : index
      %c0_8 = arith.constant 0 : index
      %13 = vector.load %arg13[%c0_7, %c0_8] : memref<2x512xbf16, #tpu.memory_space<vmem>>, vector<2x512xbf16>
      tpu.vector_store %arg13[%c0_7, %c0_8], %12 {strides = array<i32>} : memref<2x512xbf16, #tpu.memory_space<vmem>>, vector<2x512xbf16>,
    } else {
    }
    return
  }
  func.func @transform_0(%arg0: i32, %arg1: i32, %arg2: i32) -> (i32, i32) {
    %c1_i32 = arith.constant 1 : i32
    %0 = arith.subi %c1_i32, %arg1 : i32
    %1 = arith.muli %arg2, %0 : i32
    %c3_i32 = arith.constant 3 : i32
    %2 = arith.muli %c3_i32, %arg1 : i32
    %3 = arith.addi %1, %2 : i32
    %c0_i32 = arith.constant 0 : i32
    return %arg0, %3 : i32, i32
  }
  func.func @transform_1(%arg0: i32, %arg1: i32, %arg2: i32) -> (i32, i32) {
    %c1_i32 = arith.constant 1 : i32
    %0 = arith.subi %c1_i32, %arg1 : i32
    %1 = arith.muli %arg2, %0 : i32
    %c3_i32 = arith.constant 3 : i32
    %2 = arith.muli %c3_i32, %arg1 : i32
    %3 = arith.addi %1, %2 : i32
    %c0_i32 = arith.constant 0 : i32
    %c0_i32_0 = arith.constant 0 : i32
    return %3, %c0_i32 : i32, i32
  }
  func.func @transform_2(%arg0: i32, %arg1: i32, %arg2: i32) -> (i32, i32) {
    %c0_i32 = arith.constant 0 : i32
    %c0_i32_0 = arith.constant 0 : i32
    %c0_i32_1 = arith.constant 0 : i32
    return %c0_i32, %c0_i32_0 : i32, i32
  }
  func.func @transform_3(%arg0: i32, %arg1: i32, %arg2: i32) -> (i32, i32) {
    %c0_i32 = arith.constant 0 : i32
    %c0_i32_0 = arith.constant 0 : i32
    %c0_i32_1 = arith.constant 0 : i32
    return %c0_i32, %c0_i32_0 : i32, i32
  }
  func.func @transform_4(%arg0: i32, %arg1: i32, %arg2: i32) -> (i32, i32) {
    %c0_i32 = arith.constant 0 : i32
    %c0_i32_0 = arith.constant 0 : i32
    %c0_i32_1 = arith.constant 0 : i32
    return %c0_i32, %c0_i32_0 : i32, i32
  }
  func.func @transform_5(%arg0: i32, %arg1: i32, %arg2: i32) -> (i32, i32) {
    %c0_i32 = arith.constant 0 : i32
    %c0_i32_0 = arith.constant 0 : i32
    %c0_i32_1 = arith.constant 0 : i32
    return %c0_i32, %c0_i32_0 : i32, i32
  }
  func.func @transform_6(%arg0: i32, %arg1: i32, %arg2: i32) -> (i32, i32) {
    %c0_i32 = arith.constant 0 : i32
    %c0_i32_0 = arith.constant 0 : i32
    %c0_i32_1 = arith.constant 0 : i32
    return %c0_i32, %c0_i32_0 : i32, i32
  }
  func.func @transform_7(%arg0: i32, %arg1: i32, %arg2: i32) -> (i32, i32) {
    %0 = arith.muli %arg2, %arg1 : i32
    %c0_i32 = arith.constant 0 : i32
    %c0_i32_0 = arith.constant 0 : i32
    return %c0_i32, %0 : i32, i32
  }
  func.func @transform_8(%arg0: i32, %arg1: i32, %arg2: i32) -> (i32, i32) {
    %0 = arith.muli %arg2, %arg1 : i32
    %c0_i32 = arith.constant 0 : i32
    %c0_i32_0 = arith.constant 0 : i32
    return %c0_i32, %0 : i32, i32
  }
  func.func @transform_9(%arg0: i32, %arg1: i32, %arg2: i32) -> (i32, i32) {
    %c0_i32 = arith.constant 0 : i32
    %c0_i32_0 = arith.constant 0 : i32
    return %arg0, %c0_i32 : i32, i32
  }
  func.func @transform_10(%arg0: i32, %arg1: i32, %arg2: i32) -> (i32, i32) {
    %0 = arith.muli %arg2, %arg1 : i32
    %c0_i32 = arith.constant 0 : i32
    return %arg0, %0 : i32, i32
  }
  func.func @transform_11(%arg0: i32, %arg1: i32, %arg2: i32) -> (i32, i32) {
    %c0_i32 = arith.constant 0 : i32
    %c0_i32_0 = arith.constant 0 : i32
    return %arg0, %c0_i32 : i32, i32
  }
  func.func @transform_12(%arg0: i32, %arg1: i32, %arg2: i32) -> (i32, i32) {
    %c0_i32 = arith.constant 0 : i32
    %c0_i32_0 = arith.constant 0 : i32
    return %arg0, %c0_i32 : i32, i32
  }
  func.func @transform_13(%arg0: i32, %arg1: i32, %arg2: i32) -> (i32, i32) {
    %c0_i32 = arith.constant 0 : i32
    %c0_i32_0 = arith.constant 0 : i32
    return %arg0, %c0_i32 : i32, i32
  }
}

</mosaic_0001>

<bundles_post_ra>
// kernel: base_vae_forward.1
= control target key start
LH: loop header
LB: loop body
LE: loop exit
PB: predicated region body
PF: predicated region fallthrough
CT: control target
= control target key end

     0   :  { %s3124_s0 = inlined_call_operand.vmem [shape: f32[2,2048], index: 0, kind: input, shape index: {}]   ;;  %s3125_s1 = inlined_call_operand.hbm [shape: bf16[2048,128], index: 1, kind: input, shape index: {}]   ;;  %s3126_s2 = inlined_call_operand.vmem [shape: f32[1,128], index: 2, kind: input, shape index: {}]   ;;  %s3127_s3 = inlined_call_operand.vmem [shape: bf16[128,256], index: 3, kind: input, shape index: {}]   ;;  %s3128_s4 = inlined_call_operand.vmem [shape: f32[1,256], index: 4, kind: input, shape index: {}]   ;;  %s3129_s5 = inlined_call_operand.vmem [shape: bf16[128,128], index: 5, kind: input, shape index: {}]   ;;  %s3130_s6 = inlined_call_operand.vmem [shape: f32[1,128], index: 6, kind: input, shape index: {}]   ;;  %s3131_s7 = inlined_call_operand.hbm [shape: bf16[128,2048], index: 7, kind: input, shape index: {}]   ;;  %s3132_s8 = inlined_call_operand.vmem [shape: f32[1,2048], index: 8, kind: input, shape index: {}]   ;;  %s3133_s9 = inlined_call_operand.vmem [shape: f32[2,128], index: 9, kind: input, shape index: {}]   ;;  %s3134_s10 = inlined_call_operand.vmem [shape: bf16[2,2048], index: 10, kind: output, shape index: {0}]   ;;  %s3135_s11 = inlined_call_operand.hbm [shape: f32[2,128], index: 11, kind: output, shape index: {1}]   ;;  %s3136_s12 = inlined_call_operand.hbm [shape: f32[2,128], index: 12, kind: output, shape index: {2}]   ;;  %s3137_s13 = inlined_call_operand.hbm [shape: f32[2,128], index: 13, kind: output, shape index: {3}]  }
   0x1   :  { %3142 = sst [smem:[#allocation17_spill]] %s3124_s0 }
   0x2   :  { %3143 = sst [smem:[#allocation18_spill]] %s3125_s1 }
   0x3   :  { %3144 = sst [smem:[#allocation19_spill]] %s3126_s2 }
   0x4   :  { %3145 = sst [smem:[#allocation20_spill]] %s3127_s3 }
   0x5   :  { %3146 = sst [smem:[#allocation21_spill]] %s3128_s4 }
   0x6   :  { %3147 = sst [smem:[#allocation22_spill]] %s3129_s5 }
   0x7   :  { %3148 = sst [smem:[#allocation23_spill]] %s3130_s6 }
   0x8   :  { %3149 = sst [smem:[#allocation24_spill]] %s3132_s8 }
   0x9   :  { %3150 = sst [smem:[#allocation25_spill]] %s3133_s9 }
   0xa   :  { %3151 = sst [smem:[#allocation26_spill]] %s3134_s10 }
   0xb   :  { %3152 = sst [smem:[#allocation27_spill]] %s3135_s11 }
   0xc   :  { %3153 = sst [smem:[#allocation28_spill]] %s3136_s12 }
   0xd   :  { %3154 = sst [smem:[#allocation29_spill]] %s3137_s13 }
   0xe   :  { %19 = vsyncpa [#allocation5], 0 }
   0xf   :  { %21 = vsyncpa [#allocation5 + $0x1], 0 }
  0x10   :  { %22 = vsyncpa [#allocation8], 0 }
  0x11   :  { %24 = vsyncpa [#allocation8 + $0x1], 0 }
  0x12   :  { %25 = vsyncpa [#allocation6], 0 }
  0x13   :  { %26 = vsyncpa [#allocation11], 0  ;;  %s2677_s25 = smov 0   ;;  %s2679_s26 = smov 0  }
  0x14   :  { %s2681_s27 = smov 0   ;;  %s2683_s28 = smov 0  }
  0x15   :  { %s2685_s29 = smov 0   ;;  %s2687_s30 = smov 0  }
  0x16   :  { %s2689_s14 = smov 0   ;;  %s2691_s15 = smov 0  }
  0x17   :  { %s2693_s16 = smov 0   ;;  %s2695_s17 = smov 0  }
  0x18   :  { %s2697_s18 = smov 0  }
  0x19 LB: > { %s44_s20 = sadd.s32 1, %s2580_s16  ;;  %s47_s21 = sadd.s32 1, %s2584_s17  ;;  %s2588_s18 = sphi %s2697_s18, %s32_s18   ;;  %s2584_s17 = sphi %s2695_s17, %s3192_s17   ;;  %s2580_s16 = sphi %s2693_s16, %s3191_s16   ;;  %s2576_s15 = sphi %s2691_s15, %s3190_s15   ;;  %s2572_s14 = sphi %s2689_s14, %s3189_s14   ;;  %s2568_s30 = sphi %s2687_s30, %s3188_s30   ;;  %s2564_s29 = sphi %s2685_s29, %s3187_s29   ;;  %s2560_s28 = sphi %s2683_s28, %s3186_s28   ;;  %s2556_s27 = sphi %s2681_s27, %s3185_s27   ;;  %s2552_s26 = sphi %s2679_s26, %s3184_s26   ;;  %s2548_s25 = sphi %s2677_s25, %s3183_s25  }
  0x1a   : > { %p45_p0 = scmp.ge.s32.totalorder %s44_s20, 4  ;;  %s91_s22 = ssub.s32 1, %s2584_s17 }
  0x1b   : > { %s93_s23 = smul.u32 3, %s2584_s17  ;;  %s102_s13 = sadd.s32 1, %s2568_s30 }
  0x1c   : > { %s3194_s20 = smov (%p45_p0, %s44_s20), 0  ;;  %s3196_s21 = smov (!%p45_p0, %s47_s21), %s2584_s17 }
  0x1d   : > { %s92_s24 = smul.u32 %s2580_s16, %s91_s22  ;;  %p49_p1 = scmp.ge.s32.totalorder %s3196_s21, 2 }
  0x1e   : > { %p109_p2 = scmp.ne.s32.totalorder %s2568_s30, %s2564_s29  ;;  %p3141_p3 = scmp.eq.s32.totalorder %s2588_s18, 0 }
  0x1f   : > { %s94_s19 = sadd.s32 %s93_s23, %s92_s24  ;;  %s3198_s21 = smov (%p49_p1, %s3196_s21), 0 }
  0x20   : > { %p2749_p4 = por %p3141_p3, %p109_p2  ;;  %p115_p5 = scmp.ne.s32.totalorder %s2564_s29, %s2560_s28 }
  0x21   : > { %s95_s22 = ssub.s32 1, %s3198_s21  ;;  %s97_s12 = smul.u32 3, %s3198_s21 }
  0x22   : > { %s96_s6 = smul.u32 %s95_s22, %s3194_s20  ;;  %s3156_s9 = sadd.s32 4294967295, %s2588_s18  }
  0x23   : > { %p2760_p6 = scmp.eq.s32.totalorder %s3156_s9, 0  ;;  %s231_s24 = smul.u32 %s3198_s21, %s3194_s20 }
  0x24   : > { %s98_s4 = sadd.s32 %s97_s12, %s96_s6  ;;  %p3140_p8 = scmp.lt.s32.totalorder %s2588_s18, 8 }
  0x25   : > { %p2768_p7 = por %p2760_p6, %p115_p5  ;;  %s99_s28 = ssub.s32 %s94_s19, %s98_s4 }
  0x26   : > { %p100_p9 = scmp.eq.s32.totalorder %s99_s28, 0  ;;  %s477_s22 = sand.u32 1, %s2568_s30  }
  0x27   : > { %s1917_s5 = sshll.u32 %s477_s22, 8  ;;  %s2035_s9 = sshll.u32 %s94_s19, 12 }
  0x28   : > { %s2775_s3 = scalar_select %p100_p9, %s2568_s30, %s102_s13  }
  0x29   : > { %s3159_s1 = sld [smem:[#allocation18_spill]]  ;;  %s481_s6 = scalar_lea.vmem [#allocation4], %s1917_s5 }
  0x2a   : > { %s492_s12 = sshll.u32 %s481_s6, 4  ;;  %p2788_p10 = pnand %p3140_p8, %p2749_p4  ;;  %s2782_s12 = int_to_ptr.vmem [resolvable:$true] %s492_s12 }
  0x2b   : > { %s2793_s13 = scalar_lea.sflag [#allocation5], %s477_s22 }
  0x2c   : > { %p2360_p13 = pneg %p2788_p10 }
  0x2f   : > { %s2780_s0 = scalar_lea.hbm %s3159_s1, %s2035_s9  ;;  %s2363_s10 = scalar_lea.hbm %s3159_s1, 16384 }
  0x30   : > { %s2358_s19 = scalar_lea.hbm %s2780_s0, 4096 }
  0x31   : > { %p2359_p12 = scmp.ne.s32.totalorder %s2780_s0, %s2358_s19  ;;  %p2365_p2 = scmp.lt.s32.totalorder %s2363_s10, %s2358_s19 }
  0x33   : > { %p2361_p0 = pnand %p2360_p13, %p2359_p12 }
  0x35   : > { %p2362_p1 = pneg %p2361_p0 }
  0x37   : > { %p2367_p5 = pnand %p2365_p2, %p2362_p1 }
  0x39   : > { %2370 = shalt.err (!%p2367_p5)
}
  0x3a   : > { %s2371_s11 = scalar_lea.vmem %s2782_s12, 4096  ;;  %s2590_s28 = smov [#allocation4]  }
  0x3b   : > { %p2372_p4 = scmp.ne.s32.totalorder %s2782_s12, %s2371_s11  ;;  %s2376_s22 = sshll.u32 %s2590_s28, 4  ;;  %s2377_s22 = int_to_ptr.vmem [resolvable:$false] %s2376_s22 }
  0x3c   : > { %s2378_s9 = scalar_lea.vmem %s2377_s22, 8192  ;;  %p2379_p12 = scmp.lt.s32.totalorder %s2782_s12, %s2377_s22 }
  0x3d   : > { %p2374_p9 = pnand %p2372_p4, %p2360_p13  ;;  %p2380_p0 = scmp.lt.s32.totalorder %s2378_s9, %s2371_s11 }
  0x3f   : > { %p2375_p8 = pneg %p2374_p9  ;;  %p2381_p3 = por %p2380_p0, %p2379_p12 }
  0x41   : > { %p2382_p11 = pnand %p2381_p3, %p2375_p8 }
  0x43   : > { %2385 = shalt.err (!%p2382_p11)
}
  0x44   : > { %s2591_s6 = smov 64   ;;  %s2592_s19 = smov 4  }
  0x45   : > { %2129 = dma.hbm_to_vmem [thread:$0]  (!%p2788_p10), %s2780_s0, 4096, %s2782_s12, %s2793_s13, %s2591_s6, %s2591_s6, %s2592_s19  }
  0x46   : > { %p532_p3 = scmp.lt.s32.totalorder %s2588_s18, 9  ;;  %p3161_p8 = scmp.ge.s32.totalorder %s2588_s18, 1 }
  0x47   : > { %s230_s8 = smul.u32 %s2580_s16, %s2584_s17  ;;  %s235_s10 = sadd.s32 1, %s2556_s27 }
  0x48   : > { %p2813_p11 = pnand %p3161_p8, %p532_p3  ;;  %p242_p13 = scmp.ne.s32.totalorder %s2556_s27, %s2552_s26 }
  0x49   : > { %p248_p1 = scmp.ne.s32.totalorder %s2552_s26, %s2548_s25  ;;  %s232_s11 = ssub.s32 %s230_s8, %s231_s24 }
  0x4a   : > { %s502_s28 = sand.u32 1, %s2556_s27   ;;  %p233_p2 = scmp.eq.s32.totalorder %s232_s11, 0 }
  0x4b   : > { %p3163_p5 = scmp.eq.s32.totalorder %s2588_s18, 0  ;;  %p2832_p9 = por %p248_p1, %p2760_p6 }
  0x4c   : > { %s2837_s12 = scalar_select %p233_p2, %s2556_s27, %s235_s10  }
  0x4d   : > { %p244_p4 = por %p242_p13, %p3163_p5  ;;  %s1920_s4 = sshll.u32 %s502_s28, 8 }
  0x4e   : > { %s2036_s13 = sshll.u32 %s230_s8, 8  ;;  %s506_s25 = scalar_lea.vmem [#allocation7], %s1920_s4 }
  0x4f   : > { %s513_s6 = scalar_lea.hbm %s3131_s7, %s2036_s13  ;;  %s514_s19 = sshll.u32 %s506_s25, 4  ;;  %s515_s19 = int_to_ptr.vmem [resolvable:$true] %s514_s19 }
  0x50   : > { %p3165_p10 = scmp.lt.s32.totalorder %s2588_s18, 8  ;;  %s503_s23 = scalar_lea.sflag [#allocation8], %s502_s28 }
  0x51   : > { %s2399_s10 = scalar_lea.vmem %s515_s19, 4096  ;;  %s2593_s8 = smov [#allocation7]  }
  0x52   : > { %p2844_p12 = pnand %p3165_p10, %p244_p4  ;;  %p2400_p0 = scmp.ne.s32.totalorder %s515_s19, %s2399_s10 }
  0x53   : > { %s2404_s11 = sshll.u32 %s2593_s8, 4  ;;  %s2405_s11 = int_to_ptr.vmem [resolvable:$false] %s2404_s11 }
  0x54   : > { %p2388_p6 = pneg %p2844_p12  ;;  %s2406_s13 = scalar_lea.vmem %s2405_s11, 8192 }
  0x55   : > { %p2407_p13 = scmp.lt.s32.totalorder %s515_s19, %s2405_s11  ;;  %p2408_p1 = scmp.lt.s32.totalorder %s2406_s13, %s2399_s10 }
  0x56   : > { %p2402_p3 = pnand %p2400_p0, %p2388_p6 }
  0x57   : > { %p2409_p2 = por %p2408_p1, %p2407_p13 }
  0x58   : > { %p2403_p8 = pneg %p2402_p3 }
  0x5a   : > { %p2410_p5 = pnand %p2409_p2, %p2403_p8 }
  0x5c   : > { %2413 = shalt.err (!%p2410_p5)
}
  0x5d   : > { %s2594_s4 = smov 1024   ;;  %s2595_s22 = smov 256  }
  0x5e   : > { %s2596_s9 = smov 16   ;;  %536 = sbr.rel (%p2813_p11) target bundleno = 1107 (0x453), region = 60 }
  0x5f   : > { %2132 = dma.hbm_to_vmem [thread:$0]  (!%p2844_p12), %s513_s6, 4096, %s515_s19, %s503_s23, %s2594_s4, %s2595_s22, %s2596_s9  }
  0x60   : > { %s538_s28 = sand.u32 (!%p2813_p11), 1, %s2564_s29  }
  0x61   : > { %s1924_s25 = sshll.u32 (!%p2813_p11), %s538_s28, 8  ;;  %s539_s8 = scalar_lea.sflag (!%p2813_p11), [#allocation5], %s538_s28 }
  0x62   : > { %s2855_s1 = scalar_lea.vmem (!%p2813_p11), [#allocation4], %s1924_s25 }
  0x63   : > { %2531 = dma.done.wait (%p2768_p7), %s539_s8, 4096  }
  0x64   : > { %2533 = vsyncadd (%p2768_p7), %s539_s8, 4294963200  ;;  %s547_s10 = sand.u32 1, %s2552_s26  }
  0x65   : > { %s1925_s24 = sshll.u32 %s547_s10, 8  ;;  %s548_s6 = scalar_lea.sflag [#allocation8], %s547_s10 }
  0x66   : > { %s2862_s19 = scalar_lea.vmem [#allocation7], %s1925_s24 }
  0x67   : > { %2535 = dma.done.wait (%p2832_p9), %s548_s6, 4096  }
  0x68   : > { %2537 = vsyncadd (%p2832_p9), %s548_s6, 4294963200  ;;  %s625_s5 = ssub.s32 1, %s2576_s15  ;;  %s627_s2 = smul.u32 3, %s2576_s15 }
  0x69   : > { %s626_s23 = smul.u32 %s2572_s14, %s625_s5  ;;  %s3167_s25 = sld [smem:[#allocation17_spill]] }
  0x6a   : > { %s650_s11 = smul.u32 %s2572_s14, %s2576_s15  ;;  %s3168_s6 = sld [smem:[#allocation24_spill]] }
  0x6b   : > { %s628_s13 = sadd.s32 %s627_s2, %s626_s23  ;;  %p1930_p4 = scmp.ne.s32.totalorder %s2576_s15, 0 }
  0x6c   : > { %s1926_s4 = sshll.u32 %s628_s13, 2  ;;  %s1928_s22 = sshll.u32 %s650_s11, 2 }
  0x6d   : > { %p632_p7 = scmp.lt.s32.totalorder %s1926_s4, 15  ;;  %p652_p11 = scmp.lt.s32.totalorder %s1928_s22, 15 }
  0x6e   : > { %s3169_s11 = sld [smem:[#allocation26_spill]]  ;;  %p1931_p9 = scmp.ne.s32.totalorder (!%p1930_p4), %s2572_s14, 0 }
  0x6f   : > { %s3200_s4 = smov (!%p632_p7, %s1926_s4), 15  ;;  %s3202_s22 = smov (!%p652_p11, %s1928_s22), 15 }
  0x70   : > { %s1927_s0 = sshll.u32 %s3200_s4, 1  ;;  %s654_s5 = scalar_lea.vmem %s3168_s6, %s3202_s22 }
  0x71   : > { %s2878_s8 = scalar_lea.vmem %s3167_s25, %s1927_s0  ;;  %676 = sbr.rel (%p1930_p4) target bundleno = 817 (0x331), region = 72 }
  0x74   : > { %s669_s13 = scalar_lea.vmem %s3169_s11, %s3202_s22 }
  0x76   : > { %680 = sbr.rel (%p1931_p9) target bundleno = 125 (0x7d), region = 76 }
  0x7b   : > { %v2597_v0 = vmov 0.0  }
  0x7c   : > { %681 = vst [vmem:[#allocation2] sm:$0x3] %v2597_v0 }
  0x7d PF: > { %v2243_v1 = vld [vmem:[%s2855_s1 + $0x78] sm:$0xff]   ;;  %v2247_v5 = vld [vmem:[%s2855_s1 + $0x70] sm:$0xff]   ;;  %v2251_v9 = vld [vmem:[%s2855_s1 + $0x68] sm:$0xff]   ;;  %v689_v31 = vlaneseq  ;;  %v2598_v35 = vmov 1983009808   ;;  %p1964_p10 = scmp.ne.s32.totalorder %s2572_s14, 3 }
  0x7e   : > { %v2244_v2 = vld [vmem:[%s2855_s1 + $0xf8] sm:$0xff]   ;;  %2037 = vmatprep.subr.bf16.mxu0 %v2243_v1  ;;  %v2248_v6 = vld [vmem:[%s2855_s1 + $0xf0] sm:$0xff]   ;;  %v2252_v10 = vld [vmem:[%s2855_s1 + $0xe8] sm:$0xff]   ;;  %v687_v36 = vunpack.c.l.s4 %v2598_v35  ;;  %s3170_s0 = sld [smem:[#allocation20_spill]] (!%p1964_p10) }
  0x7f   : > { %v2245_v3 = vld [vmem:[%s2855_s1 + $0x38] sm:$0xff]   ;;  %2059 = vmatprep.subr.bf16.mxu1 %v2244_v2  ;;  %v2249_v7 = vld [vmem:[%s2855_s1 + $0x30] sm:$0xff]   ;;  %v2253_v11 = vld [vmem:[%s2855_s1 + $0x28] sm:$0xff]   ;;  %v2923_v37 = vshrl.u32 %v689_v31, 7  ;;  %s3171_s10 = sld [smem:[#allocation22_spill]] (!%p1964_p10) }
  0x80   : > { %v2246_v4 = vld [vmem:[%s2855_s1 + $0xb8] sm:$0xff]   ;;  %2038 = vmatpush3.bf16.msra.mxu0 %v2245_v3  ;;  %v2250_v8 = vld [vmem:[%s2855_s1 + $0xb0] sm:$0xff]   ;;  %v2254_v12 = vld [vmem:[%s2855_s1 + $0xa8] sm:$0xff]   ;;  %v688_v38 = vunpack.c.0.s8 %v687_v36  ;;  %s3172_s28 = sld [smem:[#allocation19_spill]] (!%p1964_p10) }
  0x81   : > { %2060 = vmatpush3.bf16.msra.mxu1 %v2246_v4  ;;  %2039 = vmatprep.subr.bf16.mxu0 %v2247_v5  ;;  %v2255_v13 = vld [vmem:[%s2855_s1 + $0x60] sm:$0xff]   ;;  %v2259_v17 = vld [vmem:[%s2855_s1 + $0x58] sm:$0xff]   ;;  %v2263_v21 = vld [vmem:[%s2855_s1 + $0x50] sm:$0xff]   ;;  %s3173_s25 = sld [smem:[#allocation21_spill]] (!%p1964_p10) }
  0x82   : > { %2061 = vmatprep.subr.bf16.mxu1 %v2248_v6  ;;  %v2256_v14 = vld [vmem:[%s2855_s1 + $0xe0] sm:$0xff]   ;;  %v2260_v18 = vld [vmem:[%s2855_s1 + $0xd8] sm:$0xff]   ;;  %v2264_v22 = vld [vmem:[%s2855_s1 + $0xd0] sm:$0xff]   ;;  %v691_v40 = vsub.s32 %v688_v38, %v2923_v37  ;;  %s3174_s24 = sld [smem:[#allocation25_spill]] (!%p1964_p10) }
  0x83   : > { %v2257_v15 = vld [vmem:[%s2855_s1 + $0x20] sm:$0xff]   ;;  %v2261_v19 = vld [vmem:[%s2855_s1 + $0x18] sm:$0xff]   ;;  %v2265_v23 = vld [vmem:[%s2855_s1 + $0x10] sm:$0xff]   ;;  %s3175_s23 = sld [smem:[#allocation23_spill]] (!%p1964_p10) }
  0x84   : > { %2040 = vmatpush3.bf16.msra.mxu0 %v2249_v7  ;;  %v2258_v16 = vld [vmem:[%s2855_s1 + $0xa0] sm:$0xff]   ;;  %v2262_v20 = vld [vmem:[%s2855_s1 + $0x98] sm:$0xff]   ;;  %v2266_v24 = vld [vmem:[%s2855_s1 + $0x90] sm:$0xff]  }
  0x85   : > { %2062 = vmatpush3.bf16.msra.mxu1 %v2250_v8  ;;  %2041 = vmatprep.subr.bf16.mxu0 %v2251_v9  ;;  %v2267_v25 = vld [vmem:[%s2855_s1 + $0x48] sm:$0xff]   ;;  %v2271_v29 = vld [vmem:[%s2855_s1 + $0x40] sm:$0xff]   ;;  %v682_v55 = vld [vmem:[#allocation2] sm:$0x3] }
  0x86   : > { %2063 = vmatprep.subr.bf16.mxu1 %v2252_v10  ;;  %v2268_v26 = vld [vmem:[%s2855_s1 + $0xc8] sm:$0xff]   ;;  %v2272_v30 = vld [vmem:[%s2855_s1 + $0xc0] sm:$0xff]  }
  0x87   : > { %v2269_v27 = vld [vmem:[%s2855_s1 + $0x8] sm:$0xff]   ;;  %v2273_v32 = vld [vmem:[%s2855_s1] sm:$0xff]  }
  0x88   : > { %2042 = vmatpush3.bf16.msra.mxu0 %v2253_v11  ;;  %v2270_v28 = vld [vmem:[%s2855_s1 + $0x88] sm:$0xff]   ;;  %v2274_v33 = vld [vmem:[%s2855_s1 + $0x80] sm:$0xff]  }
  0x89   : > { %2064 = vmatpush3.bf16.msra.mxu1 %v2254_v12  ;;  %2043 = vmatprep.subr.bf16.mxu0 %v2255_v13  ;;  %v683_v34 = vld [vmem:[%s2878_s8] sm:$0xff] }
  0x8a   : > { %2065 = vmatprep.subr.bf16.mxu1 %v2256_v14  ;;  %v685_v39 = vcombine.high %v683_v34, %v683_v34  ;;  %v692_v41 = vrot.slane %v683_v34, %v691_v40 }
  0x8c   : > { %2044 = vmatpush3.bf16.msra.mxu0 %v2257_v15  ;;  %v699_v42 = vrot.slane %v685_v39, %v691_v40  ;;  %v700_v43 = vcombine.high %v692_v41, %v692_v41  ;;  %v706_v45 = vpack.c.bf16 %v692_v41, %v692_v41 }
  0x8d   : > { %2066 = vmatpush3.bf16.msra.mxu1 %v2258_v16  ;;  %2045 = vmatprep.subr.bf16.mxu0 %v2259_v17 }
  0x8e   : > { %2067 = vmatprep.subr.bf16.mxu1 %v2260_v18  ;;  %v701_v44 = vcombine.high %v699_v42, %v699_v42  ;;  %v708_v46 = vpack.c.bf16 %v699_v42, %v699_v42  ;;  %v707_v47 = vpack.c.bf16 %v700_v43, %v700_v43 }
  0x90   : > { %2046 = vmatpush3.bf16.msra.mxu0 %v2261_v19  ;;  %v709_v48 = vpack.c.bf16 %v701_v44, %v701_v44  ;;  %998 = vmatprep.mubr.bf16.mxu0 %v707_v47 }
  0x91   : > { %2068 = vmatpush3.bf16.msra.mxu1 %v2262_v20  ;;  %2047 = vmatprep.subr.bf16.mxu0 %v2263_v21 }
  0x92   : > { %2069 = vmatprep.subr.bf16.mxu1 %v2264_v22  ;;  %1038 = vmatprep.mubr.bf16.mxu1 %v709_v48 }
  0x94   : > { %2048 = vmatpush3.bf16.msra.mxu0 %v2265_v23 }
  0x95   : > { %2070 = vmatpush3.bf16.msra.mxu1 %v2266_v24  ;;  %2049 = vmatprep.subr.bf16.mxu0 %v2267_v25 }
  0x96   : > { %2071 = vmatprep.subr.bf16.mxu1 %v2268_v26 }
  0x98   : > { %2050 = vmatpush3.bf16.msra.mxu0 %v2269_v27 }
  0x99   : > { %2072 = vmatpush3.bf16.msra.mxu1 %v2270_v28  ;;  %2051 = vmatprep.subr.bf16.mxu0 %v2271_v29 }
  0x9a   : > { %2073 = vmatprep.subr.bf16.mxu1 %v2272_v30 }
  0x9c   : > { %2052 = vmatpush3.bf16.msra.mxu0 %v2273_v32 }
  0x9d   : > { %2074 = vmatpush3.bf16.msra.mxu1 %v2274_v33 }
  0x9f   : > { %999 = vmatmul.mubr.bf16.vlgmr.msra.gmra.mxu0 %v706_v45 }
  0xa0   : > { %1039 = vmatmul.mubr.bf16.vlgmr.msra.gmra.mxu1 %v708_v46 }
 0x15f   : > { %v2053_v49 = vpop.f32.mrf.mxu0 }
 0x160   : > { %v2075_v50 = vpop.f32.mrf.mxu1 }
 0x161   : > { %v2054_v51 = vpop.f32.mrf.mxu0 }
 0x162   : > { %v2076_v52 = vpop.f32.mrf.mxu1  ;;  %v2055_v53 = vadd.f32 %v2054_v51, %v2053_v49 }
 0x163   : > { %v2077_v54 = vadd.f32 %v2076_v52, %v2075_v50  ;;  %v2056_v56 = vpop.f32.mrf.mxu0 }
 0x164   : > { %v2078_v57 = vpop.f32.mrf.mxu1 }
 0x165   : > { %v1041_v58 = vadd.f32 %v2077_v54, %v2055_v53  ;;  %v2057_v59 = vpop.f32.mrf.mxu0  ;;  %1051 = sbr.rel (%p1964_p10) target bundleno = 817 (0x331), region = 80 }
 0x166   : > { %v2079_v60 = vpop.f32.mrf.mxu1 }
 0x167   : > { %v1046_v61 = vadd.f32 %v1041_v58, %v682_v55 }
 0x169   : > { %1047 = vst [vmem:[#allocation2] sm:$0x3] %v1046_v61 }
 0x16a   : > { %v2276_v62 = vld [vmem:[%s3170_s0 + $0x74] ss:$8 sps:$4 sm:$0xff]   ;;  %v2278_v63 = vld [vmem:[%s3170_s0 + $0x70] ss:$8 sps:$4 sm:$0xff]   ;;  %v2599_v0 = vmov 0   ;;  %v2600_v1 = vmov 0.0  }
 0x16b   : > { %1203 = vmatprep.mubr.bf16.mxu0 %v2599_v0  ;;  %2090 = vmatprep.subr.bf16.mxu1 %v2600_v1  ;;  %v2279_v2 = vld [vmem:[%s3170_s0 + $0x64] ss:$8 sps:$4 sm:$0xff]   ;;  %v2281_v3 = vld [vmem:[%s3170_s0 + $0x60] ss:$8 sps:$4 sm:$0xff]   ;;  %v2282_v4 = vld [vmem:[%s3170_s0 + $0x54] ss:$8 sps:$4 sm:$0xff]  }
 0x16c   : > { %1171 = vmatprep.subr.bf16.mxu0 %v2276_v62  ;;  %v2284_v5 = vld [vmem:[%s3170_s0 + $0x50] ss:$8 sps:$4 sm:$0xff]   ;;  %v2285_v6 = vld [vmem:[%s3170_s0 + $0x44] ss:$8 sps:$4 sm:$0xff]   ;;  %v2287_v7 = vld [vmem:[%s3170_s0 + $0x40] ss:$8 sps:$4 sm:$0xff]  }
 0x16d   : > { %1172 = vmatpush1.bf16.msra.mxu0 %v2278_v63  ;;  %v2288_v8 = vld [vmem:[%s3170_s0 + $0x34] ss:$8 sps:$4 sm:$0xff]   ;;  %v2290_v10 = vld [vmem:[%s3170_s0 + $0x30] ss:$8 sps:$4 sm:$0xff]   ;;  %v2291_v11 = vld [vmem:[%s3170_s0 + $0x24] ss:$8 sps:$4 sm:$0xff]  }
 0x16e   : > { %1173 = vmatprep.subr.bf16.mxu0 %v2279_v2  ;;  %v2300_v9 = vld [vmem:[%s3171_s10 + $0x38] sm:$0xff]   ;;  %v2293_v12 = vld [vmem:[%s3170_s0 + $0x20] ss:$8 sps:$4 sm:$0xff]   ;;  %v2297_v18 = vld [vmem:[%s3170_s0 + $0x4] ss:$8 sps:$4 sm:$0xff]   ;;  %vm2601_vm0 = vmmov 0  }
 0x16f   : > { %2091 = vmatpush3.bf16.msra.mxu1 %v2300_v9  ;;  %v1965_v14 = vld [vmem:[%s3172_s28] ss:$0 sm:$0xff]  ;;  %v2294_v15 = vld [vmem:[%s3170_s0 + $0x14] ss:$8 sps:$4 sm:$0xff]   ;;  %v2296_v17 = vld [vmem:[%s3170_s0 + $0x10] ss:$8 sps:$4 sm:$0xff]   ;;  %2106 = vmatprep.mubr.msk.bf16.mxu1 %vm2601_vm0, %v2600_v1 }
 0x170   : > { %2092 = vmatprep.subr.bf16.mxu1 %v2600_v1  ;;  %v1052_v13 = vld [vmem:[#allocation2] sm:$0x3]  ;;  %v2301_v22 = vld [vmem:[%s3171_s10 + $0x30] sm:$0xff]   ;;  %v2302_v23 = vld [vmem:[%s3171_s10 + $0x28] sm:$0xff]   ;;  %v1083_v29 = vsub.s32 0, %v2923_v37  ;;  %v1087_v31 = vsub.s32 1, %v2923_v37 }
 0x171   : > { %1174 = vmatpush1.bf16.msra.mxu0 %v2281_v3  ;;  %v1060_v16 = vadd.f32 %v1965_v14, %v1052_v13  ;;  %v2299_v20 = vld [vmem:[%s3170_s0] ss:$8 sps:$4 sm:$0xff]   ;;  %v2304_v25 = vld [vmem:[%s3171_s10 + $0x18] sm:$0xff]   ;;  %v2305_v26 = vld [vmem:[%s3171_s10 + $0x10] sm:$0xff]  }
 0x172   : > { %1175 = vmatprep.subr.bf16.mxu0 %v2282_v4  ;;  %v2303_v24 = vld [vmem:[%s3171_s10 + $0x20] sm:$0xff]   ;;  %v2306_v27 = vld [vmem:[%s3171_s10 + $0x8] sm:$0xff]  }
 0x173   : > { %v1061_v19 = vmax.f32 %v1060_v16, 0.0  ;;  %2093 = vmatpush3.bf16.msra.mxu1 %v2301_v22  ;;  %v2307_v28 = vld [vmem:[%s3171_s10] sm:$0xff]  }
 0x174   : > { %2094 = vmatprep.subr.bf16.mxu1 %v2600_v1  ;;  %v1079_v30 = vld [vmem:[%s3173_s25] sm:$0x3] }
 0x175   : > { %1176 = vmatpush1.bf16.msra.mxu0 %v2284_v5  ;;  %v1062_v21 = vpack.c.bf16 %v1061_v19, %v1061_v19  ;;  %v1084_v32 = vrot.slane %v1079_v30, %v1083_v29  ;;  %v1088_v33 = vrot.slane %v1079_v30, %v1087_v31  ;;  %v1215_v43 = vld [vmem:[%s3174_s24] sm:$0x3] }
 0x176   : > { %1177 = vmatprep.subr.bf16.mxu0 %v2285_v6  ;;  %v1982_v47 = vld [vmem:[%s3175_s23] ss:$0 sm:$0xff] }
 0x177   : > { %2095 = vmatpush3.bf16.msra.mxu1 %v2302_v23 }
 0x178   : > { %2096 = vmatprep.subr.bf16.mxu1 %v2600_v1 }
 0x179   : > { %1178 = vmatpush1.bf16.msra.mxu0 %v2287_v7 }
 0x17a   : > { %1179 = vmatprep.subr.bf16.mxu0 %v2288_v8 }
 0x17b   : > { %2097 = vmatpush3.bf16.msra.mxu1 %v2303_v24 }
 0x17c   : > { %2098 = vmatprep.subr.bf16.mxu1 %v2600_v1 }
 0x17d   : > { %1180 = vmatpush1.bf16.msra.mxu0 %v2290_v10 }
 0x17e   : > { %1181 = vmatprep.subr.bf16.mxu0 %v2291_v11 }
 0x17f   : > { %2099 = vmatpush3.bf16.msra.mxu1 %v2304_v25 }
 0x180   : > { %2100 = vmatprep.subr.bf16.mxu1 %v2600_v1 }
 0x181   : > { %1182 = vmatpush1.bf16.msra.mxu0 %v2293_v12 }
 0x182   : > { %1183 = vmatprep.subr.bf16.mxu0 %v2294_v15 }
 0x183   : > { %2101 = vmatpush3.bf16.msra.mxu1 %v2305_v26 }
 0x184   : > { %2102 = vmatprep.subr.bf16.mxu1 %v2600_v1 }
 0x185   : > { %1184 = vmatpush1.bf16.msra.mxu0 %v2296_v17 }
 0x186   : > { %1185 = vmatprep.subr.bf16.mxu0 %v2297_v18 }
 0x187   : > { %2103 = vmatpush3.bf16.msra.mxu1 %v2306_v27 }
 0x188   : > { %2104 = vmatprep.subr.bf16.mxu1 %v2600_v1 }
 0x189   : > { %1186 = vmatpush1.bf16.msra.mxu0 %v2299_v20 }
 0x18b   : > { %2105 = vmatpush3.bf16.msra.mxu1 %v2307_v28 }
 0x18c   : > { %1204 = vmatmul.mubr.bf16.vlgmr.msra.gmra.mxu0 %v1062_v21 }
 0x24c   : > { %v1205_v34 = vpop.f32.mrf.mxu0 }
 0x24d   : > { %v1206_v35 = vadd.f32 %v1205_v34, %v1084_v32 }
 0x24e   : > { %v1207_v36 = vpop.f32.mrf.mxu0 }
 0x24f   : > { %1218 = vst [vmem:[#allocation9] sm:$0x3] %v1206_v35  ;;  %v1208_v38 = vadd.f32 %v1207_v36, %v1088_v33 }
 0x250   : > { %v1209_v39 = vpop.f32.mrf.mxu0 }
 0x251   : > { %v1212_v40 = vmul.f32 0.5, %v1208_v38  ;;  %1219 = vst [vmem:[#allocation10] sm:$0x3] %v1208_v38 }
 0x252   : > { %v1210_v41 = vpop.f32.mrf.mxu0 }
 0x253   : > { %v1213_v42 = vmul.f32 1.442695, %v1212_v40 }
 0x255   : > { %2308 = vpow2.f32 %v1213_v42 }
 0x262   : > { %v2309_v44 = vpop.eup %2308 }
 0x263   : > { %v1216_v45 = vmul.f32 %v2309_v44, %v1215_v43 }
 0x265   : > { %v1217_v37 = vadd.f32 %v1216_v45, %v1206_v35 }
 0x267   : > { %1220 = vst [vmem:[#allocation12] sm:$0x3] %v1217_v37  ;;  %v1221_v46 = vpack.c.bf16 %v1217_v37, %v1217_v37 }
 0x269   : > { %2107 = vmatmul.mubr.bf16.vlgmr.msra.gmra.mxu1 %v1221_v46 }
 0x329   : > { %v1327_v48 = vpop.f32.mrf.mxu1 }
 0x32a   : > { %v1328_v49 = vadd.f32 %v1982_v47, %v1327_v48 }
 0x32b   : > { %v2108_v50 = vpop.f32.mrf.mxu1 }
 0x32c   : > { %v1333_v51 = vmax.f32 %v1328_v49, 0.0 }
 0x32d   : > { %v1330_v52 = vpop.f32.mrf.mxu1 }
 0x32e   : > { %v1334_v53 = vpack.c.bf16 %v1333_v51, %v1333_v51 }
 0x32f   : > { %v2109_v54 = vpop.f32.mrf.mxu1 }
 0x330   : > { %1335 = vst [vmem:[#allocation3] sm:$0x1] %v1334_v53 }
 0x331 PF: > { %p1991_p12 = scmp.ne.s32.totalorder %s2576_s15, 1 }
 0x333   : > { %1339 = sbr.rel (%p1991_p12) target bundleno = 1062 (0x426), region = 84 }
 0x338   : > { %v2310_v55 = vld [vmem:[%s2862_s19 + $0xe4] ss:$16 sps:$4 sm:$0xff]   ;;  %v2312_v56 = vld [vmem:[%s2862_s19 + $0xec] ss:$16 sps:$4 sm:$0xff]   ;;  %v2602_v57 = vmov 0   ;;  %v1375_v25 = vlaneseq }
 0x339   : > { %1587 = vmatprep.mubr.bf16.mxu0 %v2602_v57  ;;  %1628 = vmatprep.mubr.bf16.mxu1 %v2602_v57  ;;  %v2314_v58 = vld [vmem:[%s2862_s19 + $0xe0] ss:$16 sps:$4 sm:$0xff]   ;;  %v2315_v59 = vld [vmem:[%s2862_s19 + $0xe8] ss:$16 sps:$4 sm:$0xff]   ;;  %v2316_v60 = vld [vmem:[%s2862_s19 + $0xc4] ss:$16 sps:$4 sm:$0xff]  }
 0x33a   : > { %1555 = vmatprep.subr.bf16.mxu0 %v2310_v55  ;;  %1596 = vmatprep.subr.bf16.mxu1 %v2312_v56  ;;  %v2318_v61 = vld [vmem:[%s2862_s19 + $0xcc] ss:$16 sps:$4 sm:$0xff]   ;;  %v2320_v62 = vld [vmem:[%s2862_s19 + $0xc0] ss:$16 sps:$4 sm:$0xff]   ;;  %v2321_v63 = vld [vmem:[%s2862_s19 + $0xc8] ss:$16 sps:$4 sm:$0xff]  }
 0x33b   : > { %1556 = vmatpush1.bf16.msra.mxu0 %v2314_v58  ;;  %1597 = vmatpush1.bf16.msra.mxu1 %v2315_v59  ;;  %v2322_v0 = vld [vmem:[%s2862_s19 + $0xa4] ss:$16 sps:$4 sm:$0xff]   ;;  %v2324_v1 = vld [vmem:[%s2862_s19 + $0xac] ss:$16 sps:$4 sm:$0xff]   ;;  %v2326_v2 = vld [vmem:[%s2862_s19 + $0xa0] ss:$16 sps:$4 sm:$0xff]  }
 0x33c   : > { %1557 = vmatprep.subr.bf16.mxu0 %v2316_v60  ;;  %1598 = vmatprep.subr.bf16.mxu1 %v2318_v61  ;;  %v2327_v3 = vld [vmem:[%s2862_s19 + $0xa8] ss:$16 sps:$4 sm:$0xff]   ;;  %v2328_v4 = vld [vmem:[%s2862_s19 + $0x84] ss:$16 sps:$4 sm:$0xff]   ;;  %v2330_v5 = vld [vmem:[%s2862_s19 + $0x8c] ss:$16 sps:$4 sm:$0xff]  }
 0x33d   : > { %v2332_v6 = vld [vmem:[%s2862_s19 + $0x80] ss:$16 sps:$4 sm:$0xff]   ;;  %v2333_v7 = vld [vmem:[%s2862_s19 + $0x88] ss:$16 sps:$4 sm:$0xff]   ;;  %v2334_v8 = vld [vmem:[%s2862_s19 + $0x64] ss:$16 sps:$4 sm:$0xff]  }
 0x33e   : > { %v2336_v9 = vld [vmem:[%s2862_s19 + $0x6c] ss:$16 sps:$4 sm:$0xff]   ;;  %v2338_v10 = vld [vmem:[%s2862_s19 + $0x60] ss:$16 sps:$4 sm:$0xff]   ;;  %v2339_v11 = vld [vmem:[%s2862_s19 + $0x68] ss:$16 sps:$4 sm:$0xff]  }
 0x33f   : > { %1558 = vmatpush1.bf16.msra.mxu0 %v2320_v62  ;;  %1599 = vmatpush1.bf16.msra.mxu1 %v2321_v63  ;;  %v2340_v12 = vld [vmem:[%s2862_s19 + $0x44] ss:$16 sps:$4 sm:$0xff]   ;;  %v2342_v13 = vld [vmem:[%s2862_s19 + $0x4c] ss:$16 sps:$4 sm:$0xff]   ;;  %v2344_v14 = vld [vmem:[%s2862_s19 + $0x40] ss:$16 sps:$4 sm:$0xff]  }
 0x340   : > { %1559 = vmatprep.subr.bf16.mxu0 %v2322_v0  ;;  %1600 = vmatprep.subr.bf16.mxu1 %v2324_v1  ;;  %v2345_v15 = vld [vmem:[%s2862_s19 + $0x48] ss:$16 sps:$4 sm:$0xff]   ;;  %v2346_v16 = vld [vmem:[%s2862_s19 + $0x24] ss:$16 sps:$4 sm:$0xff]   ;;  %v2348_v17 = vld [vmem:[%s2862_s19 + $0x2c] ss:$16 sps:$4 sm:$0xff]  }
 0x341   : > { %v2350_v18 = vld [vmem:[%s2862_s19 + $0x20] ss:$16 sps:$4 sm:$0xff]   ;;  %v2351_v19 = vld [vmem:[%s2862_s19 + $0x28] ss:$16 sps:$4 sm:$0xff]   ;;  %v2352_v20 = vld [vmem:[%s2862_s19 + $0x4] ss:$16 sps:$4 sm:$0xff]  }
 0x342   : > { %v2354_v21 = vld [vmem:[%s2862_s19 + $0xc] ss:$16 sps:$4 sm:$0xff]   ;;  %v2356_v22 = vld [vmem:[%s2862_s19] ss:$16 sps:$4 sm:$0xff]   ;;  %v2357_v23 = vld [vmem:[%s2862_s19 + $0x8] ss:$16 sps:$4 sm:$0xff]  }
 0x343   : > { %1560 = vmatpush1.bf16.msra.mxu0 %v2326_v2  ;;  %1601 = vmatpush1.bf16.msra.mxu1 %v2327_v3  ;;  %v1340_v24 = vld [vmem:[#allocation3] sm:$0x1]  ;;  %v1376_v26 = vshrl.u32 %v1375_v25, 7  ;;  %v2603_v27 = vmov 1966171168  }
 0x344   : > { %1561 = vmatprep.subr.bf16.mxu0 %v2328_v4  ;;  %1602 = vmatprep.subr.bf16.mxu1 %v2330_v5  ;;  %v1648_v28 = vunpack.c.l.s4 %v2603_v27  ;;  %v1373_v33 = vld [vmem:[%s654_s5] sm:$0xf] }
 0x345   : > { %v1377_v29 = vsub.s32 0, %v1376_v26  ;;  %v1385_v30 = vsub.s32 2, %v1376_v26  ;;  %v1381_v31 = vsub.s32 1, %v1376_v26  ;;  %v1389_v32 = vsub.s32 3, %v1376_v26 }
 0x346   : > { %v1649_v34 = vunpack.c.0.s8 %v1648_v28 }
 0x347   : > { %1562 = vmatpush1.bf16.msra.mxu0 %v2332_v6  ;;  %1603 = vmatpush1.bf16.msra.mxu1 %v2333_v7  ;;  %v1378_v35 = vrot.slane %v1373_v33, %v1377_v29  ;;  %v1386_v36 = vrot.slane %v1373_v33, %v1385_v30  ;;  %v1382_v38 = vrot.slane %v1373_v33, %v1381_v31 }
 0x348   : > { %1563 = vmatprep.subr.bf16.mxu0 %v2334_v8  ;;  %1604 = vmatprep.subr.bf16.mxu1 %v2336_v9  ;;  %v1390_v39 = vrot.slane %v1373_v33, %v1389_v32  ;;  %v1652_v43 = vsub.s32 %v1649_v34, %v1376_v26 }
 0x34b   : > { %1564 = vmatpush1.bf16.msra.mxu0 %v2338_v10  ;;  %1605 = vmatpush1.bf16.msra.mxu1 %v2339_v11 }
 0x34c   : > { %1565 = vmatprep.subr.bf16.mxu0 %v2340_v12  ;;  %1606 = vmatprep.subr.bf16.mxu1 %v2342_v13 }
 0x34f   : > { %1566 = vmatpush1.bf16.msra.mxu0 %v2344_v14  ;;  %1607 = vmatpush1.bf16.msra.mxu1 %v2345_v15 }
 0x350   : > { %1567 = vmatprep.subr.bf16.mxu0 %v2346_v16  ;;  %1608 = vmatprep.subr.bf16.mxu1 %v2348_v17 }
 0x353   : > { %1568 = vmatpush1.bf16.msra.mxu0 %v2350_v18  ;;  %1609 = vmatpush1.bf16.msra.mxu1 %v2351_v19 }
 0x354   : > { %1569 = vmatprep.subr.bf16.mxu0 %v2352_v20  ;;  %1610 = vmatprep.subr.bf16.mxu1 %v2354_v21 }
 0x357   : > { %1570 = vmatpush1.bf16.msra.mxu0 %v2356_v22  ;;  %1611 = vmatpush1.bf16.msra.mxu1 %v2357_v23 }
 0x35a   : > { %1588 = vmatmul.mubr.bf16.vlgmr.msra.gmra.mxu0 %v1340_v24  ;;  %1629 = vmatmul.mubr.bf16.vlgmr.msra.gmra.mxu1 %v1340_v24 }
 0x41a   : > { %v1589_v40 = vpop.f32.mrf.mxu0  ;;  %v1630_v41 = vpop.f32.mrf.mxu1 }
 0x41b   : > { %v1590_v45 = vadd.f32 %v1589_v40, %v1378_v35  ;;  %v1631_v37 = vadd.f32 %v1630_v41, %v1386_v36 }
 0x41c   : > { %v1591_v42 = vpop.f32.mrf.mxu0  ;;  %v1632_v44 = vpop.f32.mrf.mxu1 }
 0x41d   : > { %v1592_v46 = vadd.f32 %v1591_v42, %v1382_v38  ;;  %v1633_v47 = vadd.f32 %v1632_v44, %v1390_v39 }
 0x41e   : > { %v1593_v48 = vpop.f32.mrf.mxu0  ;;  %v1634_v49 = vpop.f32.mrf.mxu1 }
 0x41f   : > { %v2024_v50 = vpack.c.bf16 %v1592_v46, %v1590_v45  ;;  %v2025_v51 = vpack.c.bf16 %v1633_v47, %v1631_v37 }
 0x420   : > { %v1594_v52 = vpop.f32.mrf.mxu0  ;;  %v1635_v53 = vpop.f32.mrf.mxu1 }
 0x421   : > { %v1653_v54 = vrot.slane %v2024_v50, %v1652_v43  ;;  %v1660_v55 = vrot.slane %v2025_v51, %v1652_v43 }
 0x423   : > { %v1661_v56 = vcombine.low %v1653_v54, %v1660_v55 }
 0x425   : > { %2026 = vst.sshfl [vmem:[%s669_s13] sm:$0x55 pattern:$0x73625140] %v1661_v56 }
 0x426 PF: > { %s3178_s9 = sadd.s32 4294967295, %s2588_s18   ;;  %s2604_s25 = smov [#allocation10]  }
 0x427   : > { %p3058_p6 = scmp.eq.s32.totalorder %s3178_s9, 7  ;;  %s1707_s8 = sshll.u32 %s2604_s25, 4  ;;  %s1708_s8 = int_to_ptr.vmem [resolvable:$true] %s1707_s8 }
 0x428   : > { %s2414_s14 = scalar_lea.vmem %s1708_s8, 32  ;;  %p2421_p13 = scmp.lt.s32.totalorder %s1708_s8, %s1708_s8 }
 0x429   : > { %p2415_p0 = scmp.ne.s32.totalorder %s1708_s8, %s2414_s14  ;;  %p2422_p1 = scmp.lt.s32.totalorder %s2414_s14, %s2414_s14 }
 0x42b   : > { %p2416_p3 = pnand %p2415_p0, %p3058_p6  ;;  %p2423_p2 = por %p2422_p1, %p2421_p13 }
 0x42d   : > { %p2417_p8 = pneg %p2416_p3 }
 0x42f   : > { %p2424_p5 = pnand %p2423_p2, %p2417_p8 }
 0x431   : > { %2427 = shalt.err (!%p2424_p5)
}
 0x432   : > { %s3180_s24 = sld [smem:[#allocation28_spill]]  ;;  %s2605_s6 = smov [#allocation9]  }
 0x433   : > { %s1694_s2 = sshll.u32 %s2605_s6, 4  ;;  %s2606_s23 = smov [#allocation12]   ;;  %s1695_s2 = int_to_ptr.vmem [resolvable:$true] %s1694_s2 }
 0x434   : > { %s1720_s15 = sshll.u32 %s2606_s23, 4  ;;  %s2438_s11 = scalar_lea.vmem %s1695_s2, 32  ;;  %s1721_s15 = int_to_ptr.vmem [resolvable:$true] %s1720_s15 }
 0x435   : > { %p2439_p7 = scmp.ne.s32.totalorder %s1695_s2, %s2438_s11  ;;  %p2445_p9 = scmp.lt.s32.totalorder %s1695_s2, %s1695_s2 }
 0x436   : > { %p2446_p10 = scmp.lt.s32.totalorder %s2438_s11, %s2438_s11 }
 0x437   : > { %p2440_p11 = pnand %p2439_p7, %p3058_p6 }
 0x438   : > { %2117 = dma.vmem_to_hbm [thread:$0]  (%p3058_p6), %s1708_s8, 32, %s3180_s24, [#allocation11]  }
 0x439   : > { %p2441_p4 = pneg %p2440_p11  ;;  %p2447_p12 = por %p2446_p10, %p2445_p9 }
 0x43b   : > { %p2448_p0 = pnand %p2447_p12, %p2441_p4 }
 0x43d   : > { %2451 = shalt.err (!%p2448_p0)
}
 0x43e   : > { %s3181_s5 = sld [smem:[#allocation27_spill]]  ;;  %s2462_s4 = scalar_lea.vmem %s1721_s15, 32 }
 0x43f   : > { %p2463_p3 = scmp.ne.s32.totalorder %s1721_s15, %s2462_s4  ;;  %p2469_p1 = scmp.lt.s32.totalorder %s1721_s15, %s1721_s15 }
 0x440   : > { %p2470_p2 = scmp.lt.s32.totalorder %s2462_s4, %s2462_s4 }
 0x441   : > { %p2464_p8 = pnand %p2463_p3, %p3058_p6 }
 0x442   : > { %p2471_p5 = por %p2470_p2, %p2469_p1 }
 0x443   : > { %p2465_p13 = pneg %p2464_p8 }
 0x444   : > { %2115 = dma.vmem_to_hbm [thread:$0]  (%p3058_p6), %s1695_s2, 32, %s3181_s5, [#allocation6]  }
 0x445   : > { %p2472_p7 = pnand %p2471_p5, %p2465_p13 }
 0x447   : > { %2475 = shalt.err (!%p2472_p7)
}
 0x448   : > { %s3182_s8 = sld [smem:[#allocation29_spill]] }
 0x44e   : > { %2119 = dma.vmem_to_hbm [thread:$0]  (%p3058_p6), %s1721_s15, 32, %s3182_s8, [#allocation11]  }
 0x44f   : > { %2539 = dma.done.wait (%p3058_p6), [#allocation6], 32  }
 0x450   : > { %2541 = vsyncadd (%p3058_p6), [#allocation6], 4294967264 }
 0x451   : > { %2543 = dma.done.wait (%p3058_p6), [#allocation11], 64  }
 0x452   : > { %2545 = vsyncadd (%p3058_p6), [#allocation11], 4294967232 }
 0x453 PF: > { %s32_s18 = sadd.s32 1, %s2588_s18   ;;  %s3183_s25 = smov %s2552_s26 }
 0x454   : > { %p29_p11 = scmp.ge.s32.totalorder %s32_s18, 10   ;;  %s3184_s26 = smov %s2556_s27 }
 0x455   : > { %s3185_s27 = smov %s2837_s12  ;;  %s3186_s28 = smov %s2564_s29 }
 0x456   : > { %s3187_s29 = smov %s2568_s30  ;;  %s3188_s30 = smov %s2775_s3 }
 0x457   : > { %s3189_s14 = smov %s2580_s16  ;;  %s3190_s15 = smov %s2584_s17 }
 0x458   : > { %s3191_s16 = smov %s3194_s20  ;;  %s3192_s17 = smov %s3198_s21 }
 0x459   :  { %31 = sbr.rel (!%p29_p11) target bundleno = 25 (0x19), region = 166 }
 0x45e   :  { %1753 = vsyncpa [#allocation5], 1 }
 0x45f   :  { %1755 = vsyncpa [#allocation5 + $0x1], 1 }
 0x460   :  { %1756 = vsyncpa [#allocation8], 1 }
 0x461   :  { %1758 = vsyncpa [#allocation8 + $0x1], 1 }
 0x462   :  { %1759 = vsyncpa [#allocation6], 1 }
 0x463   :  { %1761 = vsyncpa [#allocation6 + $0x1], 1 }
 0x464   :  { %1762 = vsyncpa [#allocation11], 1 }

</bundles_post_ra>
